<compile_context>
chip_gen: v7x
topology: tpu7x:2x2x1
jax: 0.10.0
libtpu: 0.0.40
codegen_flags: <defaults>
</compile_context>

<pallas_src>
import math
import functools

import jax
import jax.numpy as jnp
from jax.experimental import pallas as pl
from jax.experimental.pallas import tpu as pltpu


def _make_pe(d_model: int, max_len: int) -> jnp.ndarray:
    """Deterministic buffer construction, mirrors the PyTorch __init__ exactly."""
    position = jnp.arange(max_len, dtype=jnp.float32)[:, None]                  # [max_len, 1]
    div_term = jnp.exp(jnp.arange(0, d_model, 2, dtype=jnp.float32)
                       * (-math.log(10000.0) / d_model))                        # [d_model/2]
    pe = jnp.zeros((max_len, 1, d_model), dtype=jnp.float32)
    pe = pe.at[:, 0, 0::2].set(jnp.sin(position * div_term))
    pe = pe.at[:, 0, 1::2].set(jnp.cos(position * div_term))
    return pe


def _choose_seq_tile(S: int, B: int, D: int, x_itemsize: int,
                     budget_bytes: int = 12 * 1024 * 1024) -> int:
    """Largest multiple-of-8 sequence tile whose double-buffered VMEM footprint
    (x block + out block + pe block, including (8,128) tile padding) fits the budget."""
    pad_b = -(-B // 8) * 8
    pad_d = -(-D // 128) * 128
    row_x = pad_b * pad_d * x_itemsize      # one seq row of the x block in VMEM
    row_o = pad_b * pad_d * x_itemsize      # one seq row of the out block in VMEM
    row_pe = 8 * pad_d * 4                  # one seq row of the pe block (f32, sublane-padded)
    per_row = 2 * (row_x + row_o + row_pe)  # x2 for pipeline double-buffering
    ts = budget_bytes // max(per_row, 1)
    ts = max(8, (ts // 8) * 8)
    return min(ts, S)


def _temporal_encoding_kernel(seed_ref, x_ref, pe_ref, o_ref, *, p, training):
    # Hot path: (TS, B, D) + (TS, 1, D) -> broadcast over the batch (sublane) axis.
    y = x_ref[...].astype(jnp.float32) + pe_ref[...]
    if training and p > 0.0:
        # Inverted dropout with an integer-threshold mask on raw PRNG bits.
        # NOTE: the mask is deterministic per (seed, block), so it depends on the chosen
        # tile size — acceptable for dropout (documented per review).
        pltpu.prng_seed(seed_ref[0] + pl.program_id(0))
        bits = pltpu.bitcast(pltpu.prng_random_bits(y.shape), jnp.uint32)
        threshold = jnp.uint32(min(int(p * 4294967296.0), 4294967295))
        keep = bits >= threshold                       # P(keep) = 1 - p
        y = jnp.where(keep, y * (1.0 / (1.0 - p)), 0.0)
    o_ref[...] = y.astype(o_ref.dtype)


def temporal_encoding_sine(x: jnp.ndarray,
                           pe: jnp.ndarray,
                           *,
                           p: float = 0.1,
                           training: bool = False,
                           seed=0) -> jnp.ndarray:
    """x: [S, B, D] (f32 or bf16).  pe: [max_len, 1, D] f32.  Returns [S, B, D] in x.dtype."""
    S, B, D = x.shape
    pe_s = pe[:S]                                      # [S, 1, D], glue slice in plain JAX

    TS = _choose_seq_tile(S, B, D, x.dtype.itemsize)
    grid = (pl.cdiv(S, TS),)

    # Runtime scalar seed (SMEM scalar prefetch): no recompile when the seed changes.
    seed_arr = jnp.full((1,), seed, dtype=jnp.int32)

    kernel = functools.partial(_temporal_encoding_kernel,
                               p=float(p), training=bool(training))

    return pl.pallas_call(
        kernel,
        out_shape=jax.ShapeDtypeStruct((S, B, D), x.dtype),
        grid_spec=pltpu.PrefetchScalarGridSpec(
            num_scalar_prefetch=1,
            grid=grid,
            in_specs=[
                # x block: full batch & d_model (satisfies the (8,128)-or-full rule),
                # tiled along the sequence axis for pipelined streaming.
                pl.BlockSpec((TS, B, D), lambda i, seed_ref: (i, 0, 0)),
                # pe block: same seq tile, broadcast over batch inside the kernel.
                pl.BlockSpec((TS, 1, D), lambda i, seed_ref: (i, 0, 0)),
            ],
            out_specs=pl.BlockSpec((TS, B, D), lambda i, seed_ref: (i, 0, 0)),
        ),
        compiler_params=pltpu.CompilerParams(
            # Per-block PRNG seeding makes results order-independent -> safe to shard the
            # grid across v7x's two TensorCores; neutral on single-TC v5e/v6e.
            dimension_semantics=("parallel",),
            vmem_limit_bytes=32 * 1024 * 1024,
        ),
    )(seed_arr, x, pe_s)


if __name__ == "__main__":
    # Small shapes consistent with forward(): x is [seq_len, batch, d_model]
    seq_len, batch, d_model = 8, 2, 32
    max_len = 64

    key = jax.random.PRNGKey(0)
    x = jax.random.normal(key, (seq_len, batch, d_model), dtype=jnp.float32)

    pe = _make_pe(d_model, max_len)

    # Eval-mode run: dropout is identity. Training-mode dropout is implemented in-kernel
    # via the TPU hardware PRNG (set training=True to enable).
    out = temporal_encoding_sine(x, pe, p=0.1, training=False, seed=0)
    out = jax.block_until_ready(out)

    # Correctness check against the pure-JAX reference of the forward pass (eval mode).
    ref = x + pe[:seq_len]
    assert out.shape == (seq_len, batch, d_model)
    assert jnp.allclose(out, ref, atol=1e-6, rtol=1e-6)

    print("KERNEL_OK")
</pallas_src>

<mosaic_0001>
module attributes {stable_mosaic.version = 11 : i64} {
  func.func @_temporal_encoding_kernel(%arg0: i32, %arg1: memref<1xi32, #tpu.memory_space<smem>>, %arg2: memref<8x2x32xf32, #tpu.memory_space<vmem>>, %arg3: memref<8x1x32xf32, #tpu.memory_space<vmem>>, %arg4: memref<8x2x32xf32, #tpu.memory_space<vmem>>) attributes {dimension_semantics = [#tpu.dimension_semantics<parallel>], iteration_bounds = array<i64: 1>, scalar_prefetch = 1 : i64, scratch_operands = 0 : i64, tpu.core_type = #tpu.core_type<tc>, window_params = [{transform_indices = @transform_0, window_bounds = array<i64: 8, 2, 32>}, {transform_indices = @transform_1, window_bounds = array<i64: 8, 1, 32>}, {transform_indices = @transform_2, window_bounds = array<i64: 8, 2, 32>}]} {
    %c0 = arith.constant 0 : index
    %c0_0 = arith.constant 0 : index
    %c0_1 = arith.constant 0 : index
    %0 = vector.load %arg2[%c0, %c0_0, %c0_1] : memref<8x2x32xf32, #tpu.memory_space<vmem>>, vector<8x2x32xf32>
    %c0_2 = arith.constant 0 : index
    %c0_3 = arith.constant 0 : index
    %c0_4 = arith.constant 0 : index
    %1 = vector.load %arg3[%c0_2, %c0_3, %c0_4] : memref<8x1x32xf32, #tpu.memory_space<vmem>>, vector<8x1x32xf32>
    %2 = vector.broadcast %1 : vector<8x1x32xf32> to vector<8x2x32xf32>
    %3 = arith.addf %0, %2 : vector<8x2x32xf32>
    %c0_5 = arith.constant 0 : index
    %c0_6 = arith.constant 0 : index
    %c0_7 = arith.constant 0 : index
    %4 = vector.load %arg4[%c0_5, %c0_6, %c0_7] : memref<8x2x32xf32, #tpu.memory_space<vmem>>, vector<8x2x32xf32>
    tpu.vector_store %arg4[%c0_5, %c0_6, %c0_7], %3 {strides = array<i32>} : memref<8x2x32xf32, #tpu.memory_space<vmem>>, vector<8x2x32xf32>,
    return
  }
  func.func @transform_0(%arg0: i32, %arg1: memref<1xi32, #tpu.memory_space<smem>>) -> (i32, i32, i32) {
    %c0_i32 = arith.constant 0 : i32
    %c0_i32_0 = arith.constant 0 : i32
    %c0_i32_1 = arith.constant 0 : i32
    return %arg0, %c0_i32, %c0_i32_0 : i32, i32, i32
  }
  func.func @transform_1(%arg0: i32, %arg1: memref<1xi32, #tpu.memory_space<smem>>) -> (i32, i32, i32) {
    %c0_i32 = arith.constant 0 : i32
    %c0_i32_0 = arith.constant 0 : i32
    %c0_i32_1 = arith.constant 0 : i32
    return %arg0, %c0_i32, %c0_i32_0 : i32, i32, i32
  }
  func.func @transform_2(%arg0: i32, %arg1: memref<1xi32, #tpu.memory_space<smem>>) -> (i32, i32, i32) {
    %c0_i32 = arith.constant 0 : i32
    %c0_i32_0 = arith.constant 0 : i32
    %c0_i32_1 = arith.constant 0 : i32
    return %arg0, %c0_i32, %c0_i32_0 : i32, i32, i32
  }
}

</mosaic_0001>

<bundles_post_ra>
// kernel: tpu_custom_call.1
= control target key start
LH: loop header
LB: loop body
LE: loop exit
PB: predicated region body
PF: predicated region fallthrough
CT: control target
= control target key end

     0   :  { %9 = vsyncpa [#allocation5], 0  ;;  %s308_s0 = inlined_call_operand.<no memory space> [shape: s32[1], index: 0, kind: input, shape index: {}]   ;;  %s309_s1 = inlined_call_operand.hbm [shape: f32[8,2,32], index: 1, kind: input, shape index: {}]   ;;  %s310_s2 = inlined_call_operand.hbm [shape: f32[8,1,32], index: 2, kind: input, shape index: {}]   ;;  %s311_s3 = inlined_call_operand.hbm [shape: f32[8,2,32], index: 3, kind: output, shape index: {}]  }
   0x1   :  { %10 = vsyncpa [#allocation8], 0 }
   0x2   :  { %11 = vsyncpa [#allocation6], 0  ;;  %s228_s12 = smov [#allocation4]   ;;  %s156_s16 = scalar_lea.hbm %s309_s1, 256 }
   0x3   :  { %s17_s13 = sshll.u32 %s228_s12, 4  ;;  %p157_p0 = scmp.ne.s32.totalorder %s309_s1, %s156_s16  ;;  %s18_s13 = int_to_ptr.vmem [resolvable:$true] %s17_s13 }
   0x4   :  { %p160_p1 = scmp.lt.u32.totalorder %s156_s16, %s309_s1 }
   0x6   :  { %p162_p2 = pnand %p160_p1, %p157_p0 }
   0x8   :  { %165 = shalt.err (!%p162_p2)
}
   0x9   :  { %s166_s20 = scalar_lea.vmem %s18_s13, 256  ;;  %p171_p4 = scmp.lt.s32.totalorder %s18_s13, %s18_s13 }
   0xa   :  { %p167_p3 = scmp.ne.s32.totalorder %s18_s13, %s166_s20  ;;  %p172_p5 = scmp.lt.s32.totalorder %s166_s20, %s166_s20 }
   0xc   :  { %p173_p6 = por %p172_p5, %p171_p4 }
   0xe   :  { %p174_p7 = pnand %p173_p6, %p167_p3 }
  0x10   :  { %177 = shalt.err (!%p174_p7)
}
  0x11   :  { %s229_s21 = smov 32   ;;  %s230_s22 = smov 2  }
  0x12   :  { %23 = dma.hbm_to_vmem [thread:$0]  %s309_s1, 256, %s18_s13, [#allocation5], %s229_s21, %s229_s21, %s230_s22  }
  0x13   :  { %s231_s25 = smov [#allocation7]   ;;  %s178_s29 = scalar_lea.hbm %s310_s2, 128 }
  0x14   :  { %s29_s26 = sshll.u32 %s231_s25, 4  ;;  %p179_p8 = scmp.ne.s32.totalorder %s310_s2, %s178_s29  ;;  %s30_s26 = int_to_ptr.vmem [resolvable:$true] %s29_s26 }
  0x15   :  { %p182_p9 = scmp.lt.u32.totalorder %s178_s29, %s310_s2 }
  0x17   :  { %p184_p10 = pnand %p182_p9, %p179_p8 }
  0x19   :  { %187 = shalt.err (!%p184_p10)
}
  0x1a   :  { %s188_s7 = scalar_lea.vmem %s30_s26, 128  ;;  %p193_p12 = scmp.lt.s32.totalorder %s30_s26, %s30_s26 }
  0x1b   :  { %p189_p11 = scmp.ne.s32.totalorder %s30_s26, %s188_s7  ;;  %p194_p13 = scmp.lt.s32.totalorder %s188_s7, %s188_s7 }
  0x1d   :  { %p195_p0 = por %p194_p13, %p193_p12 }
  0x1f   :  { %p196_p1 = pnand %p195_p0, %p189_p11 }
  0x21   :  { %199 = shalt.err (!%p196_p1)
}
  0x22   :  { %s232_s1 = smov 16   ;;  %s233_s8 = smov 1  }
  0x23   :  { %35 = dma.hbm_to_vmem [thread:$0]  %s310_s2, 128, %s30_s26, [#allocation8], %s232_s1, %s232_s1, %s233_s8  }
  0x24   :  { %222 = dma.done.wait [#allocation5], 256  }
  0x25   :  { %223 = vsyncadd [#allocation5], 4294967040 }
  0x26   :  { %224 = dma.done.wait [#allocation8], 128  }
  0x27   :  { %225 = vsyncadd [#allocation8], 4294967168  ;;  %vm114_vm0 = vcmask 254976   ;;  %s234_s11 = smov [#allocation9]   ;;  %v42_v0 = vld [vmem:[#allocation4] sm:$0x3] }
  0x28   :  { %s282_s12 = sshll.u32 %s234_s11, 4  ;;  %v141_v1 = vld [vmem:[#allocation7] ss:$0 sm:$0xff]  ;;  %v43_v2 = vld [vmem:[#allocation4 + $0x2] sm:$0x3]  ;;  %s129_s12 = int_to_ptr.vmem [resolvable:$true] %s282_s12 }
  0x29   :  { %v106_v3 = vadd.f32 %v141_v1, %v42_v0  ;;  %v142_v4 = vld [vmem:[#allocation7 + $0x1] ss:$0 sm:$0xff]  ;;  %v44_v5 = vld [vmem:[#allocation4 + $0x4] sm:$0x3]  ;;  %v143_v6 = vld [vmem:[#allocation7 + $0x2] ss:$0 sm:$0xff]  ;;  %p205_p3 = scmp.lt.s32.totalorder %s129_s12, %s129_s12 }
  0x2a   :  { %v107_v7 = vadd.f32 %v142_v4, %v43_v2  ;;  %v108_v8 = vadd.f32 %v143_v6, %v44_v5  ;;  %v45_v9 = vld [vmem:[#allocation4 + $0x6] sm:$0x3]  ;;  %v144_v10 = vld [vmem:[#allocation7 + $0x3] ss:$0 sm:$0xff]  ;;  %v46_v11 = vld [vmem:[#allocation4 + $0x8] sm:$0x3] }
  0x2b   :  { %115 = vst.msk [vmem:[#allocation9] sm:$0x3] %vm114_vm0, %v106_v3  ;;  %v109_v12 = vadd.f32 %v144_v10, %v45_v9  ;;  %v145_v13 = vld [vmem:[#allocation7 + $0x4] ss:$0 sm:$0xff]  ;;  %v47_v14 = vld [vmem:[#allocation4 + $0xa] sm:$0x3] }
  0x2c   :  { %v146_v15 = vld [vmem:[#allocation7 + $0x5] ss:$0 sm:$0xff]  ;;  %116 = vst.msk [vmem:[#allocation9 + $0x2] sm:$0x3] %vm114_vm0, %v107_v7  ;;  %117 = vst.msk [vmem:[#allocation9 + $0x4] sm:$0x3] %vm114_vm0, %v108_v8  ;;  %v110_v16 = vadd.f32 %v145_v13, %v46_v11 }
  0x2d   :  { %v111_v17 = vadd.f32 %v146_v15, %v47_v14  ;;  %v48_v18 = vld [vmem:[#allocation4 + $0xc] sm:$0x3]  ;;  %v147_v19 = vld [vmem:[#allocation7 + $0x6] ss:$0 sm:$0xff]  ;;  %v49_v20 = vld [vmem:[#allocation4 + $0xe] sm:$0x3] }
  0x2e   :  { %118 = vst.msk [vmem:[#allocation9 + $0x6] sm:$0x3] %vm114_vm0, %v109_v12  ;;  %v112_v21 = vadd.f32 %v147_v19, %v48_v18  ;;  %v148_v22 = vld [vmem:[#allocation7 + $0x7] ss:$0 sm:$0xff]  ;;  %119 = vst.msk [vmem:[#allocation9 + $0x8] sm:$0x3] %vm114_vm0, %v110_v16 }
  0x2f   :  { %120 = vst.msk [vmem:[#allocation9 + $0xa] sm:$0x3] %vm114_vm0, %v111_v17  ;;  %v113_v23 = vadd.f32 %v148_v22, %v49_v20  ;;  %s200_s2 = scalar_lea.vmem %s129_s12, 256 }
  0x30   :  { %121 = vst.msk [vmem:[#allocation9 + $0xc] sm:$0x3] %vm114_vm0, %v112_v21  ;;  %p201_p2 = scmp.ne.s32.totalorder %s129_s12, %s200_s2  ;;  %p206_p4 = scmp.lt.s32.totalorder %s200_s2, %s200_s2 }
  0x31   :  { %122 = vst.msk [vmem:[#allocation9 + $0xe] sm:$0x3] %vm114_vm0, %v113_v23 }
  0x32   :  { %p207_p5 = por %p206_p4, %p205_p3 }
  0x34   :  { %p208_p6 = pnand %p207_p5, %p201_p2 }
  0x36   :  { %211 = shalt.err (!%p208_p6)
}
  0x37   :  { %s212_s15 = scalar_lea.hbm %s311_s3, 256 }
  0x38   :  { %p213_p7 = scmp.ne.s32.totalorder %s311_s3, %s212_s15  ;;  %p216_p8 = scmp.lt.u32.totalorder %s212_s15, %s311_s3 }
  0x3a   :  { %p218_p9 = pnand %p216_p8, %p213_p7 }
  0x3c   :  { %221 = shalt.err (!%p218_p9)
}
  0x3d   :  { %134 = dma.vmem_to_hbm [thread:$0]  %s129_s12, 256, %s311_s3, [#allocation6], %s229_s21, %s229_s21, %s230_s22  }
  0x3e   :  { %226 = dma.done.wait [#allocation6], 256  }
  0x3f   :  { %227 = vsyncadd [#allocation6], 4294967040 }
  0x40   :  { %138 = vsyncpa [#allocation5], 1 }
  0x41   :  { %139 = vsyncpa [#allocation8], 1 }
  0x42   :  { %140 = vsyncpa [#allocation6], 1 }

</bundles_post_ra>
